<compile_context>
chip_gen: v5e
topology: v5e:2x2
jax: 0.10.0
libtpu: 0.0.40
codegen_flags: <defaults>
</compile_context>

<pallas_src>
import functools

import jax
import jax.numpy as jnp
from jax.experimental import pallas as pl
from jax.experimental.pallas import tpu as pltpu

LANE = 128     # TPU lane width (last-dim alignment)
SUBLANE = 8    # f32 sublane count
PACK = 16      # bf16 sublane pack (contraction-dim alignment)


def _round_up(n, m):
    return (n + m - 1) // m * m


# ----------------------------------------------------------------------------
# Fused Pallas kernel:
#   relu-linear -> single fused (mu|log_var) head matmul -> reparameterize
# ----------------------------------------------------------------------------
def _vae_labels_kernel(x_ref, w1_ref, b1_ref, wh_ref, bh_ref, eps_ref,
                       z_ref, mu_ref, lv_ref):
    # h = relu(x @ W1 + b1)            (bf16 MXU matmul, f32 accumulation)
    h = jnp.dot(x_ref[...], w1_ref[...], preferred_element_type=jnp.float32)
    h = jnp.maximum(h + b1_ref[...], 0.0)

    # Single fused head matmul on the VMEM-resident hidden activation.
    # Only the first Hk (=padded h_dim) columns of h feed the head weights.
    hk = wh_ref.shape[0]
    hb = h[:, :hk].astype(jnp.bfloat16)
    head = jnp.dot(hb, wh_ref[...], preferred_element_type=jnp.float32)
    head = head + bh_ref[...]

    # Split the 2*Zp-wide result with static, lane-aligned slices.
    zp = mu_ref.shape[1]
    mu = head[:, :zp]
    lv = head[:, zp:]

    mu_ref[...] = mu
    lv_ref[...] = lv
    # z = mu + eps * exp(0.5 * log_var)   (fused reparameterization epilogue)
    z_ref[...] = mu + eps_ref[...] * jnp.exp(0.5 * lv)


def _fused_call(xp, w1p, b1p, whp, bhp, epsp, zp_dim):
    Bp = xp.shape[0]
    # Gridless call: whole arrays land in VMEM once, no pipeline machinery,
    # no double-buffered copies of the (tiny) inputs.  Total VMEM footprint is
    # ~0.1 MiB, far below any generation's capacity -> no vmem_limit needed.
    vmem = lambda: pl.BlockSpec(memory_space=pltpu.MemorySpace.VMEM)
    return pl.pallas_call(
        _vae_labels_kernel,
        out_shape=(
            jax.ShapeDtypeStruct((Bp, zp_dim), jnp.float32),   # z
            jax.ShapeDtypeStruct((Bp, zp_dim), jnp.float32),   # mu
            jax.ShapeDtypeStruct((Bp, zp_dim), jnp.float32),   # log_var
        ),
        in_specs=[vmem() for _ in range(6)],
        out_specs=(vmem(), vmem(), vmem()),
    )(xp, w1p, b1p, whp, bhp, epsp)


# ----------------------------------------------------------------------------
# Parameters: PyTorch-layout raw weights + one-off padded/bf16 prep
# ----------------------------------------------------------------------------
def init_raw_params(key, x_dim, h_dim, z_dim):
    """Deterministic synthetic init, PyTorch Linear layout (out, in)."""
    k1, k2, k3, k4, k5, k6 = jax.random.split(key, 6)
    s = 0.1
    return {
        "w1":  (s * jax.random.normal(k1, (h_dim, x_dim))).astype(jnp.float32),
        "b1":  (s * jax.random.normal(k2, (h_dim,))).astype(jnp.float32),
        "w21": (s * jax.random.normal(k3, (z_dim, h_dim))).astype(jnp.float32),
        "b21": (s * jax.random.normal(k4, (z_dim,))).astype(jnp.float32),
        "w22": (s * jax.random.normal(k5, (z_dim, h_dim))).astype(jnp.float32),
        "b22": (s * jax.random.normal(k6, (z_dim,))).astype(jnp.float32),
    }


def prepare_params(raw, x_dim, h_dim, z_dim):
    """Transpose to (in, out), fuse the two heads along the output lane dim,
    pad contraction dims to the bf16 pack (16) and lane dims to 128, cast
    matmul weights to bf16.  Done once; zero runtime cost per forward."""
    Xp = _round_up(x_dim, PACK)    # W1 contraction dim (sublane of W1)
    Hp = _round_up(h_dim, LANE)    # layer-1 output lane dim: must be 128-aligned
    Hk = _round_up(h_dim, PACK)    # head contraction dim (sublane of W_head)
    Zp = _round_up(z_dim, LANE)    # head output lane dim per head: 128-aligned

    def pad2(a, rows, cols, dtype):
        out = jnp.zeros((rows, cols), dtype)
        return out.at[: a.shape[0], : a.shape[1]].set(a.astype(dtype))

    # Fused head weight/bias: [W_mu | W_logvar] in the lane (output) dim.
    w_head = jnp.zeros((Hk, 2 * Zp), jnp.bfloat16)
    w_head = w_head.at[:h_dim, :z_dim].set(raw["w21"].T.astype(jnp.bfloat16))
    w_head = w_head.at[:h_dim, Zp:Zp + z_dim].set(raw["w22"].T.astype(jnp.bfloat16))
    b_head = jnp.zeros((1, 2 * Zp), jnp.float32)
    b_head = b_head.at[0, :z_dim].set(raw["b21"].astype(jnp.float32))
    b_head = b_head.at[0, Zp:Zp + z_dim].set(raw["b22"].astype(jnp.float32))

    b1 = jnp.zeros((1, Hp), jnp.float32)
    b1 = b1.at[0, :h_dim].set(raw["b1"].astype(jnp.float32))

    return {
        "w1":     pad2(raw["w1"].T, Xp, Hp, jnp.bfloat16),   # (16, 128)
        "b1":     b1,                                        # (1, 128)
        "w_head": w_head,                                    # (32, 256)
        "b_head": b_head,                                    # (1, 256)
        "x_dim": x_dim,
        "z_dim": z_dim,
    }


# ----------------------------------------------------------------------------
# Forward pass (mirrors VAElabels.forward; also returns mu / log_var for KL)
# ----------------------------------------------------------------------------
def vae_labels_forward(prep, x_labels, eps):
    B, x_dim = x_labels.shape
    z_dim = prep["z_dim"]
    Xp = prep["w1"].shape[0]
    Zp = prep["w_head"].shape[1] // 2
    Bp = _round_up(B, SUBLANE)

    # Single pad op for x (no zeros+scatter).  eps generated at (Bp, Zp) by
    # the caller needs no padding at all; otherwise pad it the same way.
    xp = jnp.pad(x_labels.astype(jnp.bfloat16),
                 ((0, Bp - B), (0, Xp - x_dim)))
    if eps.shape == (Bp, Zp):
        epsp = eps.astype(jnp.float32)
    else:
        epsp = jnp.pad(eps.astype(jnp.float32),
                       ((0, Bp - eps.shape[0]), (0, Zp - eps.shape[1])))

    zp, mup, lvp = _fused_call(xp, prep["w1"], prep["b1"],
                               prep["w_head"], prep["b_head"], epsp, Zp)
    # Padded rows/lanes hold non-meaningful values (relu(b1) on zero rows);
    # never read beyond [:B, :z_dim].
    return zp[:B, :z_dim], mup[:B, :z_dim], lvp[:B, :z_dim]


# ----------------------------------------------------------------------------
if __name__ == "__main__":
    key = jax.random.PRNGKey(0)
    kp, kx, ke = jax.random.split(key, 3)

    # Small shapes consistent with the module (one-hot-ish label VAE).
    B, X_DIM, H_DIM, H2_DIM, Z_DIM = 8, 10, 32, 16, 5  # h2label_dim unused in forward

    raw = init_raw_params(kp, X_DIM, H_DIM, Z_DIM)
    prep = prepare_params(raw, X_DIM, H_DIM, Z_DIM)

    Bp = _round_up(B, SUBLANE)
    Zp = prep["w_head"].shape[1] // 2

    x = jax.random.normal(kx, (B, X_DIM), jnp.float32)
    # eps generated directly at the padded shape (replaces torch.randn_like);
    # only the [:B, :Z_DIM] block is meaningful.
    eps_pad = jax.random.normal(ke, (Bp, Zp), jnp.float32)

    fwd = jax.jit(functools.partial(vae_labels_forward, prep))
    z, mu, log_var = fwd(x, eps_pad)
    jax.block_until_ready(z)

    # Pure-JAX f32 reference (PyTorch semantics) for a sanity check.
    eps = eps_pad[:B, :Z_DIM]
    h_ref = jax.nn.relu(x @ raw["w1"].T + raw["b1"])
    mu_ref = h_ref @ raw["w21"].T + raw["b21"]
    lv_ref = h_ref @ raw["w22"].T + raw["b22"]
    z_ref = mu_ref + eps * jnp.exp(0.5 * lv_ref)

    assert z.shape == (B, Z_DIM)
    assert mu.shape == (B, Z_DIM) and log_var.shape == (B, Z_DIM)
    assert bool(jnp.allclose(mu, mu_ref, atol=2e-2, rtol=2e-2)), "mu mismatch"
    assert bool(jnp.allclose(log_var, lv_ref, atol=2e-2, rtol=2e-2)), "log_var mismatch"
    assert bool(jnp.allclose(z, z_ref, atol=2e-2, rtol=2e-2)), "z mismatch"
    print("KERNEL_OK")
</pallas_src>

<mosaic_0001>
module attributes {stable_mosaic.version = 11 : i64} {
  func.func @_vae_labels_kernel(%arg0: memref<8x16xbf16, #tpu.memory_space<vmem>>, %arg1: memref<16x128xbf16, #tpu.memory_space<vmem>>, %arg2: memref<1x128xf32, #tpu.memory_space<vmem>>, %arg3: memref<32x256xbf16, #tpu.memory_space<vmem>>, %arg4: memref<1x256xf32, #tpu.memory_space<vmem>>, %arg5: memref<8x128xf32, #tpu.memory_space<vmem>>, %arg6: memref<8x128xf32, #tpu.memory_space<vmem>>, %arg7: memref<8x128xf32, #tpu.memory_space<vmem>>, %arg8: memref<8x128xf32, #tpu.memory_space<vmem>>) attributes {dimension_semantics = [], scalar_prefetch = 0 : i64, scratch_operands = 0 : i64, tpu.core_type = #tpu.core_type<tc>} {
    %c0 = arith.constant 0 : index
    %c0_0 = arith.constant 0 : index
    %0 = vector.load %arg0[%c0, %c0_0] : memref<8x16xbf16, #tpu.memory_space<vmem>>, vector<8x16xbf16>
    %c0_1 = arith.constant 0 : index
    %c0_2 = arith.constant 0 : index
    %1 = vector.load %arg1[%c0_1, %c0_2] : memref<16x128xbf16, #tpu.memory_space<vmem>>, vector<16x128xbf16>
    %cst = arith.constant dense<0.000000e+00> : vector<8x128xf32>
    %2 = tpu.matmul %0, %1, %cst {dimension_numbers = #tpu.dot_dimension_numbers<[1], [0], [0], [1], [0, 0, 1, 1], [], []>} : vector<8x16xbf16>, vector<16x128xbf16>, vector<8x128xf32> -> vector<8x128xf32>
    %c0_3 = arith.constant 0 : index
    %c0_4 = arith.constant 0 : index
    %3 = vector.load %arg2[%c0_3, %c0_4] : memref<1x128xf32, #tpu.memory_space<vmem>>, vector<1x128xf32>
    %4 = vector.broadcast %3 : vector<1x128xf32> to vector<8x128xf32>
    %5 = arith.addf %2, %4 : vector<8x128xf32>
    %cst_5 = arith.constant 0.000000e+00 : f32
    %6 = vector.broadcast %cst_5 : f32 to vector<8x128xf32>
    %7 = arith.maximumf %5, %6 : vector<8x128xf32>
    %8 = vector.extract_strided_slice %7 {offsets = [0, 0], sizes = [8, 32], strides = [1, 1]} : vector<8x128xf32> to vector<8x32xf32>
    %9 = arith.truncf %8 : vector<8x32xf32> to vector<8x32xbf16>
    %c0_6 = arith.constant 0 : index
    %c0_7 = arith.constant 0 : index
    %10 = vector.load %arg3[%c0_6, %c0_7] : memref<32x256xbf16, #tpu.memory_space<vmem>>, vector<32x256xbf16>
    %cst_8 = arith.constant dense<0.000000e+00> : vector<8x256xf32>
    %11 = tpu.matmul %9, %10, %cst_8 {dimension_numbers = #tpu.dot_dimension_numbers<[1], [0], [0], [1], [0, 0, 1, 1], [], []>} : vector<8x32xbf16>, vector<32x256xbf16>, vector<8x256xf32> -> vector<8x256xf32>
    %c0_9 = arith.constant 0 : index
    %c0_10 = arith.constant 0 : index
    %12 = vector.load %arg4[%c0_9, %c0_10] : memref<1x256xf32, #tpu.memory_space<vmem>>, vector<1x256xf32>
    %13 = vector.broadcast %12 : vector<1x256xf32> to vector<8x256xf32>
    %14 = arith.addf %11, %13 : vector<8x256xf32>
    %15 = vector.extract_strided_slice %14 {offsets = [0, 0], sizes = [8, 128], strides = [1, 1]} : vector<8x256xf32> to vector<8x128xf32>
    %16 = vector.extract_strided_slice %14 {offsets = [0, 128], sizes = [8, 128], strides = [1, 1]} : vector<8x256xf32> to vector<8x128xf32>
    %c0_11 = arith.constant 0 : index
    %c0_12 = arith.constant 0 : index
    %17 = vector.load %arg7[%c0_11, %c0_12] : memref<8x128xf32, #tpu.memory_space<vmem>>, vector<8x128xf32>
    tpu.vector_store %arg7[%c0_11, %c0_12], %15 {strides = array<i32>} : memref<8x128xf32, #tpu.memory_space<vmem>>, vector<8x128xf32>,
    %c0_13 = arith.constant 0 : index
    %c0_14 = arith.constant 0 : index
    %18 = vector.load %arg8[%c0_13, %c0_14] : memref<8x128xf32, #tpu.memory_space<vmem>>, vector<8x128xf32>
    tpu.vector_store %arg8[%c0_13, %c0_14], %16 {strides = array<i32>} : memref<8x128xf32, #tpu.memory_space<vmem>>, vector<8x128xf32>,
    %c0_15 = arith.constant 0 : index
    %c0_16 = arith.constant 0 : index
    %19 = vector.load %arg5[%c0_15, %c0_16] : memref<8x128xf32, #tpu.memory_space<vmem>>, vector<8x128xf32>
    %cst_17 = arith.constant 5.000000e-01 : f32
    %20 = vector.broadcast %cst_17 : f32 to vector<8x128xf32>
    %21 = arith.mulf %20, %16 : vector<8x128xf32>
    %22 = math.exp %21 : vector<8x128xf32>
    %23 = arith.mulf %19, %22 : vector<8x128xf32>
    %24 = arith.addf %15, %23 : vector<8x128xf32>
    %c0_18 = arith.constant 0 : index
    %c0_19 = arith.constant 0 : index
    %25 = vector.load %arg6[%c0_18, %c0_19] : memref<8x128xf32, #tpu.memory_space<vmem>>, vector<8x128xf32>
    tpu.vector_store %arg6[%c0_18, %c0_19], %24 {strides = array<i32>} : memref<8x128xf32, #tpu.memory_space<vmem>>, vector<8x128xf32>,
    return
  }
}

</mosaic_0001>

<bundles_post_ra>
// kernel: vae_labels_forward.1
= control target key start
LH: loop header
LB: loop body
LE: loop exit
PB: predicated region body
PF: predicated region fallthrough
CT: control target
= control target key end

     0   :  { %14 = vsyncpa [#allocation3], 0  ;;  %s411_s0 = inlined_call_operand.vmem [shape: bf16[8,16], index: 0, kind: input, shape index: {}]   ;;  %s412_s1 = inlined_call_operand.vmem [shape: bf16[16,128], index: 1, kind: input, shape index: {}]   ;;  %s413_s2 = inlined_call_operand.vmem [shape: f32[1,128], index: 2, kind: input, shape index: {}]   ;;  %s414_s3 = inlined_call_operand.hbm [shape: bf16[32,256], index: 3, kind: input, shape index: {}]   ;;  %s415_s4 = inlined_call_operand.vmem [shape: f32[1,256], index: 4, kind: input, shape index: {}]   ;;  %s416_s5 = inlined_call_operand.vmem [shape: f32[8,128], index: 5, kind: input, shape index: {}]   ;;  %s417_s6 = inlined_call_operand.hbm [shape: f32[8,128], index: 6, kind: output, shape index: {0}]   ;;  %s418_s7 = inlined_call_operand.hbm [shape: f32[8,128], index: 7, kind: output, shape index: {1}]   ;;  %s419_s8 = inlined_call_operand.hbm [shape: f32[8,128], index: 8, kind: output, shape index: {2}]  }
   0x1   :  { %15 = vsyncpa [#allocation4], 0 }
   0x2   :  { %16 = vsyncpa [#allocation7], 0  ;;  %s27_s29 = sshll.u32 %s414_s3, 4  ;;  %s333_s30 = smov [#allocation2]   ;;  %s28_s29 = int_to_ptr.hbm [resolvable:$true] %s27_s29 }
   0x3   :  { %s29_s9 = sshll.u32 %s333_s30, 4  ;;  %s334_s10 = smov 128   ;;  %s30_s9 = int_to_ptr.vmem [resolvable:$true] %s29_s9 }
   0x4   :  { %s335_s11 = smov 8  }
   0x5   :  { %35 = dma.hbm_to_vmem [thread:$0]  %s28_s29, 512, %s30_s9, [#allocation3], %s334_s10, %s334_s10, %s335_s11  }
   0x6   :  { %327 = dma.done.wait [#allocation3], 512  }
   0x7   :  { %328 = vsyncadd [#allocation3], 4294966784  ;;  %v217_v0 = vld [vmem:[%s412_s1] sm:$0xff]  ;;  %vm58_vm0 = vcmask 130048   ;;  %v209_v2 = vld [vmem:[#allocation2 + $0x10] sm:$0xf] }
   0x8   :  { %69 = vmatpush.bf16.msra.mxu0 %v217_v0  ;;  %v45_v1 = vld [vmem:[%s411_s0] sm:$0xf]  ;;  %v221_v3 = vld [vmem:[#allocation2 + $0x14] sm:$0xf0]  ;;  %v220_v4 = vld [vmem:[#allocation2 + $0x14] sm:$0xf] }
   0x9   :  { %v210_v5 = vor.u32 %v221_v3, %v209_v2  ;;  %v211_v6 = vld [vmem:[#allocation2 + $0x18] sm:$0xf0]  ;;  %v201_v8 = vld [vmem:[#allocation2] sm:$0xf]  ;;  %v219_v9 = vld [vmem:[#allocation2 + $0x4] sm:$0xf0] }
   0xa   :  { %v214_v7 = vor.u32 %v220_v4, %v211_v6  ;;  %v218_v10 = vld [vmem:[#allocation2 + $0x4] sm:$0xf]  ;;  %v202_v11 = vor.u32 %v219_v9, %v201_v8  ;;  %v203_v12 = vld [vmem:[#allocation2 + $0x8] sm:$0xf0]  ;;  %v228_v14 = vld [vmem:[%s413_s2] ss:$0 sm:$0xff] }
   0xb   :  { %198 = vmatmul.msk.bf16.vlgmr.msra.gmra.mxu0 %vm58_vm0, %v45_v1  ;;  %117 = vmatpush.bf16.msra.mxu1 %v210_v5  ;;  %v206_v13 = vor.u32 %v218_v10, %v203_v12  ;;  %vm107_vm1 = vcmask 261120   ;;  %v81_v20 = vld [vmem:[%s415_s4] sm:$0x3]  ;;  %s336_s17 = smov [#allocation6]   ;;  %s164_s21 = sshll.u32 %s418_s7, 4  ;;  %s165_s21 = int_to_ptr.hbm [resolvable:$true] %s164_s21 }
   0xc   :  { %130 = vmatpush.bf16.msra.mxu2 %v214_v7  ;;  %v83_v21 = vperm.slane %v81_v20, 0  ;;  %s162_s18 = sshll.u32 %s336_s17, 4  ;;  %v84_v24 = vperm.slane %v81_v20, 1  ;;  %s337_s2 = smov [#allocation8]   ;;  %v139_v31 = vld [vmem:[%s416_s5] sm:$0xff]  ;;  %s163_s18 = int_to_ptr.vmem [resolvable:$true] %s162_s18 }
   0xd   :  { %s173_s22 = sshll.u32 %s337_s2, 4  ;;  %s175_s25 = sshll.u32 %s419_s8, 4  ;;  %s174_s22 = int_to_ptr.vmem [resolvable:$true] %s173_s22  ;;  %s176_s25 = int_to_ptr.hbm [resolvable:$true] %s175_s25 }
   0xe   :  { %s338_s26 = smov [#allocation5]   ;;  %s153_s29 = sshll.u32 %s417_s6, 4  ;;  %s154_s29 = int_to_ptr.hbm [resolvable:$true] %s153_s29 }
   0xf   :  { %118 = vmatpush.bf16.msra.mxu1 %v202_v11  ;;  %s151_s27 = sshll.u32 %s338_s26, 4  ;;  %s152_s27 = int_to_ptr.vmem [resolvable:$true] %s151_s27 }
  0x10   :  { %131 = vmatpush.bf16.msra.mxu2 %v206_v13 }
  0x88   :  { %v71_v15 = vpop.f32.mrf.mxu0 }
  0x89   :  { %v72_v16 = vadd.f32 %v228_v14, %v71_v15 }
  0x8b   :  { %v75_v17 = vmax.f32 %v72_v16, 0.0 }
  0x8d   :  { %v76_v18 = vpack.c.bf16 %v75_v17, %v75_v17 }
  0x8f   :  { %215 = vmatmul.msk.bf16.vlgmr.msra.gmra.mxu1 %vm107_vm1, %v76_v18  ;;  %216 = vmatmul.msk.bf16.vlgmr.msra.gmra.mxu2 %vm107_vm1, %v76_v18 }
  0x90   :  { %v73_v19 = vpop.f32.mrf.mxu0 }
 0x10c   :  { %v120_v22 = vpop.f32.mrf.mxu1 }
 0x10d   :  { %v121_v23 = vadd.f32 %v120_v22, %v83_v21 }
 0x10f   :  { %137 = vst [vmem:[#allocation6] sm:$0xff] %v121_v23 }
 0x110   :  { %167 = dma.vmem_to_hbm [thread:$0]  %s163_s18, 128, %s165_s21, [#allocation7]  }
 0x112   :  { %v133_v25 = vpop.f32.mrf.mxu2 }
 0x113   :  { %v134_v26 = vadd.f32 %v133_v25, %v84_v24 }
 0x114   :  { %v122_v27 = vpop.f32.mrf.mxu1 }
 0x115   :  { %138 = vst [vmem:[#allocation8] sm:$0xff] %v134_v26  ;;  %v140_v28 = vmul.f32 0.5, %v134_v26 }
 0x116   :  { %178 = dma.vmem_to_hbm [thread:$0]  %s174_s22, 128, %s176_s25, [#allocation7]  }
 0x117   :  { %v141_v29 = vmul.f32 1.442695, %v140_v28 }
 0x119   :  { %229 = vpow2.f32 %v141_v29 }
 0x11a   :  { %v135_v30 = vpop.f32.mrf.mxu2 }
 0x11f   :  { %v230_v32 = vpop.eup %229 }
 0x120   :  { %v143_v33 = vmul.f32 %v230_v32, %v139_v31 }
 0x122   :  { %v144_v34 = vadd.f32 %v143_v33, %v121_v23 }
 0x124   :  { %145 = vst [vmem:[#allocation5] sm:$0xff] %v144_v34 }
 0x125   :  { %156 = dma.vmem_to_hbm [thread:$0]  %s152_s27, 128, %s154_s29, [#allocation4]  }
 0x126   :  { %329 = dma.done.wait [#allocation4], 128  }
 0x127   :  { %330 = vsyncadd [#allocation4], 4294967168 }
 0x128   :  { %331 = dma.done.wait [#allocation7], 256  }
 0x129   :  { %332 = vsyncadd [#allocation7], 4294967040 }
 0x12a   :  { %191 = vsyncpa [#allocation3], 1 }
 0x12b   :  { %192 = vsyncpa [#allocation4], 1 }
 0x12c   :  { %193 = vsyncpa [#allocation7], 1 }

</bundles_post_ra>
